<compile_context>
chip_gen: v7x
topology: tpu7x:2x2x1
jax: 0.10.0
libtpu: 0.0.40
codegen_flags: <defaults>
</compile_context>

<pallas_src>
import jax
import jax.numpy as jnp
from jax.experimental import pallas as pl
from jax.experimental.pallas import tpu as pltpu

# Model / problem sizes (small, consistent with the module's forward contract).
B, C_IN, H, W = 2, 4, 16, 16
C_OUT = 8
KH = KW = 3
N_CLASSES = 10
LANE = 128            # lane-dense padded classifier width
M = B * H * W         # 512 flattened (batch, spatial) positions
HW = H * W            # 256 lanes per batch element (multiple of 128 -> free slices)
KC = KH * KW * C_IN   # 36 im2col contraction length
KC_PAD = 40           # 36 patch rows + 1 ones-row (bias) + 3 zero rows -> 5 sublane groups


def base_model_kernel(patches_ref, w1b_ref, w2b_ref, out_ref):
    """Single fused step over the whole batch.

    patches_ref : (KC_PAD, M) = (40, 512)  im2col patches, lane-dense,
                                           row 36 = ones (bias), rows 37-39 = 0
    w1b_ref     : (C_OUT, KC_PAD) = (8, 40) conv weights | bias col | zero pad
    w2b_ref     : (C_OUT + 1, LANE) = (9, 128) classifier weights (rows 0-7)
                                              and bias (row 8), zero-padded lanes
    out_ref     : (B, LANE)                 padded logits
    """
    # Conv + bias in one lane-dense MXU matmul: (8, 40) @ (40, 512) -> (8, 512).
    acc = jax.lax.dot_general(
        w1b_ref[...], patches_ref[...],
        (((1,), (0,)), ((), ())),
        preferred_element_type=jnp.float32)
    acc = jnp.maximum(acc, 0.0)

    # Global average pool per batch element: B free 256-lane slices reduced on
    # the XLU; no pool-matrix DMA, no transpose of the (8, 512) accumulator.
    cols = [jnp.sum(acc[:, b * HW:(b + 1) * HW], axis=-1, keepdims=True)
            for b in range(B)]
    pooled = jnp.concatenate(cols, axis=-1) * jnp.float32(1.0 / HW)  # (C_OUT, B)

    # Classifier: contract the channel dim (dim 0 of the tiny (8, B) pooled
    # result against dim 0 of w2) -> lane-dense (B, 128) output, then bias row.
    w2 = w2b_ref[:C_OUT, :]        # (8, 128) static slice (zero-cost view)
    b2 = w2b_ref[C_OUT:, :]        # (1, 128)
    logits = jax.lax.dot_general(
        pooled, w2, (((0,), (0,)), ((), ())),
        preferred_element_type=jnp.float32) + b2
    out_ref[...] = logits


def prepare_params(params):
    """One-time parameter packing (hoisted out of the per-call hot path)."""
    w1, b1, w2, b2 = params["w1"], params["b1"], params["w2"], params["b2"]
    # (8, 40): flattened conv weights (row order ky,kx,c) | bias column | zeros.
    w1_flat_t = w1.reshape(KC, C_OUT).T.astype(jnp.float32)          # (8, 36)
    b1_col = b1.reshape(C_OUT, 1).astype(jnp.float32)                # (8, 1)
    w1b = jnp.concatenate(
        [w1_flat_t, b1_col, jnp.zeros((C_OUT, KC_PAD - KC - 1), jnp.float32)],
        axis=1)                                                      # (8, 40)
    # (9, 128): classifier weights rows 0-7, bias row 8, zero-padded lanes.
    w2b = jnp.zeros((C_OUT + 1, LANE), jnp.float32)
    w2b = w2b.at[:C_OUT, :N_CLASSES].set(w2.astype(jnp.float32))
    w2b = w2b.at[C_OUT, :N_CLASSES].set(b2.reshape(-1).astype(jnp.float32))
    return w1b, w2b


def _build_patches(x_nchw):
    """im2col directly in (KC_PAD, M) orientation (no large output transpose)."""
    xp = jnp.pad(x_nchw.astype(jnp.float32),
                 ((0, 0), (0, 0), (1, 1), (1, 1)))                   # (B, C, H+2, W+2)
    xp = jnp.transpose(xp, (1, 0, 2, 3))                             # (C, B, H+2, W+2)
    taps = [xp[:, :, ky:ky + H, kx:kx + W].reshape(C_IN, M)
            for ky in range(KH) for kx in range(KW)]
    patches = jnp.concatenate(taps, axis=0)                          # (36, 512)
    ones_row = jnp.ones((1, M), jnp.float32)                         # bias row
    pad_rows = jnp.zeros((KC_PAD - KC - 1, M), jnp.float32)
    return jnp.concatenate([patches, ones_row, pad_rows], axis=0)    # (40, 512)


@jax.jit
def self_modifying_model_forward(x_nchw, w1b, w2b):
    """forward(x) == base_model(x): thin layout glue + one fused kernel call."""
    patches = _build_patches(x_nchw)
    out = pl.pallas_call(
        base_model_kernel,
        out_shape=jax.ShapeDtypeStruct((B, LANE), jnp.float32),
        in_specs=[pl.BlockSpec(memory_space=pltpu.MemorySpace.VMEM)
                  for _ in range(3)],
        out_specs=pl.BlockSpec(memory_space=pltpu.MemorySpace.VMEM),
    )(patches, w1b, w2b)
    return out[:, :N_CLASSES]


def reference_forward(x_nchw, params):
    """Pure-JAX reference for correctness checking (same math, NHWC)."""
    w1, b1, w2, b2 = params["w1"], params["b1"], params["w2"], params["b2"]
    x = jnp.transpose(x_nchw, (0, 2, 3, 1)).astype(jnp.float32)
    xp = jnp.pad(x, ((0, 0), (1, 1), (1, 1), (0, 0)))
    acc = jnp.zeros((B, H, W, C_OUT), jnp.float32)
    for ky in range(KH):
        for kx in range(KW):
            patch = xp[:, ky:ky + H, kx:kx + W, :]
            acc = acc + jnp.einsum("bhwc,co->bhwo", patch, w1[ky, kx])
    acc = jnp.maximum(acc + b1[0][None, None, None, :], 0.0)
    pooled = jnp.mean(acc, axis=(1, 2))
    return pooled @ w2 + b2[0][None, :]


def make_params(key):
    k1, k2, k3, k4 = jax.random.split(key, 4)
    return {
        "w1": (jax.random.normal(k1, (KH, KW, C_IN, C_OUT), jnp.float32) * 0.1),
        "b1": (jax.random.normal(k2, (1, C_OUT), jnp.float32) * 0.01),
        "w2": (jax.random.normal(k3, (C_OUT, N_CLASSES), jnp.float32) * 0.1),
        "b2": (jax.random.normal(k4, (1, N_CLASSES), jnp.float32) * 0.01),
    }


if __name__ == "__main__":
    key = jax.random.PRNGKey(0)
    kx, kp = jax.random.split(key)
    # PyTorch-style NCHW input, matching the conv base model.
    x = jax.random.normal(kx, (B, C_IN, H, W), jnp.float32)
    params = make_params(kp)

    # One-time parameter packing (outside the per-call hot path).
    w1b, w2b = prepare_params(params)
    w1b, w2b = jax.block_until_ready((w1b, w2b))

    out = self_modifying_model_forward(x, w1b, w2b)
    out = jax.block_until_ready(out)

    ref = reference_forward(x, params)
    assert out.shape == (B, N_CLASSES)
    assert jnp.allclose(out, ref, atol=1e-4, rtol=1e-4), "mismatch vs reference"

    # TODO(synk): modify_architecture / evolve_architecture are Python-side
    # control logic (no tensor compute) and have no Pallas equivalent.
    print("KERNEL_OK")
</pallas_src>

<mosaic_0001>
module attributes {stable_mosaic.version = 11 : i64} {
  func.func @base_model_kernel(%arg0: memref<40x512xf32, #tpu.memory_space<vmem>>, %arg1: memref<8x40xf32, #tpu.memory_space<vmem>>, %arg2: memref<9x128xf32, #tpu.memory_space<vmem>>, %arg3: memref<2x128xf32, #tpu.memory_space<vmem>>) attributes {dimension_semantics = [], scalar_prefetch = 0 : i64, scratch_operands = 0 : i64, tpu.core_type = #tpu.core_type<tc>} {
    %c0 = arith.constant 0 : index
    %c0_0 = arith.constant 0 : index
    %0 = vector.load %arg1[%c0, %c0_0] : memref<8x40xf32, #tpu.memory_space<vmem>>, vector<8x40xf32>
    %c0_1 = arith.constant 0 : index
    %c0_2 = arith.constant 0 : index
    %1 = vector.load %arg0[%c0_1, %c0_2] : memref<40x512xf32, #tpu.memory_space<vmem>>, vector<40x512xf32>
    %cst = arith.constant dense<0.000000e+00> : vector<8x512xf32>
    %2 = tpu.matmul %0, %1, %cst {dimension_numbers = #tpu.dot_dimension_numbers<[1], [0], [0], [1], [0, 0, 1, 1], [], []>} : vector<8x40xf32>, vector<40x512xf32>, vector<8x512xf32> -> vector<8x512xf32>
    %cst_3 = arith.constant 0.000000e+00 : f32
    %3 = vector.broadcast %cst_3 : f32 to vector<8x512xf32>
    %4 = arith.maximumf %2, %3 : vector<8x512xf32>
    %5 = vector.extract_strided_slice %4 {offsets = [0, 0], sizes = [8, 256], strides = [1, 1]} : vector<8x512xf32> to vector<8x256xf32>
    %cst_4 = arith.constant dense<0.000000e+00> : vector<8xf32>
    %6 = vector.multi_reduction <add>, %5, %cst_4 [1] : vector<8x256xf32> to vector<8xf32>
    %7 = vector.shape_cast %6 : vector<8xf32> to vector<8x1xf32>
    %8 = vector.extract_strided_slice %4 {offsets = [0, 256], sizes = [8, 256], strides = [1, 1]} : vector<8x512xf32> to vector<8x256xf32>
    %cst_5 = arith.constant dense<0.000000e+00> : vector<8xf32>
    %9 = vector.multi_reduction <add>, %8, %cst_5 [1] : vector<8x256xf32> to vector<8xf32>
    %10 = vector.shape_cast %9 : vector<8xf32> to vector<8x1xf32>
    %11 = tpu.concatenate %7, %10 in 1 : vector<8x1xf32>, vector<8x1xf32> -> vector<8x2xf32>
    %cst_6 = arith.constant 3.906250e-03 : f32
    %12 = vector.broadcast %cst_6 : f32 to vector<8x2xf32>
    %13 = arith.mulf %11, %12 : vector<8x2xf32>
    %c0_7 = arith.constant 0 : index
    %c0_8 = arith.constant 0 : index
    %14 = vector.load %arg2[%c0_7, %c0_8] : memref<9x128xf32, #tpu.memory_space<vmem>>, vector<8x128xf32>
    %c8 = arith.constant 8 : index
    %c0_9 = arith.constant 0 : index
    %15 = vector.load %arg2[%c8, %c0_9] : memref<9x128xf32, #tpu.memory_space<vmem>>, vector<1x128xf32>
    %cst_10 = arith.constant dense<0.000000e+00> : vector<2x128xf32>
    %16 = tpu.matmul %13, %14, %cst_10 {dimension_numbers = #tpu.dot_dimension_numbers<[0], [0], [1], [1], [0, 1, 1, 1], [], []>} : vector<8x2xf32>, vector<8x128xf32>, vector<2x128xf32> -> vector<2x128xf32>
    %17 = vector.broadcast %15 : vector<1x128xf32> to vector<2x128xf32>
    %18 = arith.addf %16, %17 : vector<2x128xf32>
    %c0_11 = arith.constant 0 : index
    %c0_12 = arith.constant 0 : index
    %19 = vector.load %arg3[%c0_11, %c0_12] : memref<2x128xf32, #tpu.memory_space<vmem>>, vector<2x128xf32>
    tpu.vector_store %arg3[%c0_11, %c0_12], %18 {strides = array<i32>} : memref<2x128xf32, #tpu.memory_space<vmem>>, vector<2x128xf32>,
    return
  }
}

</mosaic_0001>

<bundles_post_ra>
// kernel: self_modifying_model_forward.1
= control target key start
LH: loop header
LB: loop body
LE: loop exit
PB: predicated region body
PF: predicated region fallthrough
CT: control target
= control target key end

     0   :  { %v376_v7 = vmov 0.0   ;;  %s480_s0 = inlined_call_operand.vmem [shape: f32[40,512], index: 0, kind: input, shape index: {}]   ;;  %s481_s1 = inlined_call_operand.vmem [shape: f32[8,40], index: 1, kind: input, shape index: {}]   ;;  %s482_s2 = inlined_call_operand.vmem [shape: f32[9,128], index: 2, kind: input, shape index: {}]   ;;  %s483_s3 = inlined_call_operand.hbm [shape: f32[2,128], index: 3, kind: output, shape index: {}]  }
   0x1   :  { %v17_v0 = vld [vmem:[%s480_s0 + $0x8] sm:$0xff]  ;;  %v16_v2 = vld [vmem:[%s480_s0] sm:$0xff]  ;;  %v19_v5 = vld [vmem:[%s480_s0 + $0x18] sm:$0xff]  ;;  %104 = vmatprep.mubr.f32.mxu0 %v376_v7  ;;  %175 = vmatprep.mubr.f32.mxu1 %v376_v7 }
   0x2   :  { %v21_v1 = vld [vmem:[%s480_s0 + $0x28] sm:$0xff]  ;;  %v20_v4 = vld [vmem:[%s480_s0 + $0x20] sm:$0xff]  ;;  %v23_v6 = vld [vmem:[%s480_s0 + $0x38] sm:$0xff] }
   0x3   :  { %v333_v3 = vpack.c.bf16 %v21_v1, %v17_v0  ;;  %v335_v8 = vpack.c.bf16 %v20_v4, %v16_v2  ;;  %v341_v9 = vpack.c.bf16 %v23_v6, %v19_v5  ;;  %v25_v10 = vld [vmem:[%s480_s0 + $0x48] sm:$0xff]  ;;  %v18_v12 = vld [vmem:[%s480_s0 + $0x10] sm:$0xff]  ;;  %v24_v15 = vld [vmem:[%s480_s0 + $0x40] sm:$0xff] }
   0x4   :  { %v29_v11 = vld [vmem:[%s480_s0 + $0x68] sm:$0xff]  ;;  %v22_v14 = vld [vmem:[%s480_s0 + $0x30] sm:$0xff]  ;;  %v28_v16 = vld [vmem:[%s480_s0 + $0x60] sm:$0xff] }
   0x5   :  { %334 = vmatprep.subr.bf16.mxu0 %v333_v3  ;;  %v337_v13 = vpack.c.bf16 %v29_v11, %v25_v10  ;;  %342 = vmatprep.subr.bf16.mxu1 %v341_v9  ;;  %v343_v17 = vpack.c.bf16 %v22_v14, %v18_v12  ;;  %v339_v18 = vpack.c.bf16 %v28_v16, %v24_v15  ;;  %v27_v19 = vld [vmem:[%s480_s0 + $0x58] sm:$0xff]  ;;  %v26_v22 = vld [vmem:[%s480_s0 + $0x50] sm:$0xff]  ;;  %v33_v24 = vld [vmem:[%s480_s0 + $0x88] sm:$0xff] }
   0x6   :  { %336 = vmatpush1.bf16.msra.mxu0 %v335_v8  ;;  %v31_v20 = vld [vmem:[%s480_s0 + $0x78] sm:$0xff]  ;;  %v30_v23 = vld [vmem:[%s480_s0 + $0x70] sm:$0xff] }
   0x7   :  { %338 = vmatprep.subr.bf16.mxu0 %v337_v13  ;;  %v345_v21 = vpack.c.bf16 %v31_v20, %v27_v19  ;;  %344 = vmatpush1.bf16.msra.mxu1 %v343_v17  ;;  %v347_v25 = vpack.c.bf16 %v30_v23, %v26_v22 }
   0x9   :  { %346 = vmatprep.subr.bf16.mxu1 %v345_v21 }
   0xa   :  { %8 = vsyncpa [#allocation3], 0  ;;  %340 = vmatpush1.bf16.msra.mxu0 %v339_v18  ;;  %v35_v26 = vld [vmem:[%s480_s0 + $0x98] sm:$0xff]  ;;  %v32_v27 = vld [vmem:[%s480_s0 + $0x80] sm:$0xff]  ;;  %vm36_vm0 = vcmask 326656   ;;  %vm377_vm1 = vmmov 0  }
   0xb   :  { %48 = vmatprep.subr.mxu0 %v33_v24  ;;  %348 = vmatpush1.bf16.msra.mxu1 %v347_v25  ;;  %v15_v28 = vld [vmem:[%s481_s1] sm:$0xff]  ;;  %v34_v29 = vld [vmem:[%s480_s0 + $0x90] sm:$0xff]  ;;  %vm192_vm2 = vcmask 7168   ;;  %vm233_vm3 = vcmask 64512   ;;  %v324_v46 = vld [vmem:[%s482_s2 + $0x8] ss:$0 sm:$0xff] }
   0xc   :  { %119 = vmatprep.subr.mxu1 %v35_v26  ;;  %v195_v40 = vld [vmem:[%s482_s2] sm:$0xff]  ;;  %s378_s29 = smov [#allocation2]  }
   0xd   :  { %s314_s30 = sshll.u32 %s378_s29, 4  ;;  %s315_s30 = int_to_ptr.vmem [resolvable:$true] %s314_s30 }
   0xe   :  { %49 = vmatpush1.msra.mxu0 %v32_v27  ;;  %s352_s4 = scalar_lea.vmem %s315_s30, 32  ;;  %p357_p1 = scmp.lt.s32.totalorder %s315_s30, %s315_s30 }
   0xf   :  { %322 = vmatmul.mubr.msk.f32.vlgmr.msra.gmra.mrb[0].mxu0 %vm36_vm0, %v15_v28  ;;  %328 = vmatprep.subr.mxu0 %v376_v7  ;;  %p353_p0 = scmp.ne.s32.totalorder %s315_s30, %s352_s4  ;;  %p358_p2 = scmp.lt.s32.totalorder %s352_s4, %s352_s4 }
  0x10   :  { %120 = vmatpush1.msra.mxu1 %v34_v29  ;;  %329 = vmatpush3.msra.mxu0 %v195_v40 }
  0x11   :  { %323 = vmatmul.mubr.msk.f32.vlgmr.msra.gmra.mrb[0].mxu1 %vm36_vm0, %v15_v28  ;;  %330 = vmatprep.mubr.msk.f32.mxu0 %vm377_vm1, %v376_v7  ;;  %p359_p3 = por %p358_p2, %p357_p1 }
  0x13   :  { %p360_p4 = pnand %p359_p3, %p353_p0 }
  0xe2   :  { %v106_v30 = vpop.f32.mrb[0].mxu0 }
  0xe3   :  { %v182_v31 = vmax.f32 %v106_v30, 0.0  ;;  %v108_v32 = vpop.f32.mrb[1].mxu0 }
  0xe4   :  { %v183_v33 = vmax.f32 %v108_v32, 0.0  ;;  %v177_v34 = vpop.f32.mrb[0].mxu1 }
  0xe5   :  { %v184_v35 = vmax.f32 %v177_v34, 0.0  ;;  %v179_v36 = vpop.f32.mrb[1].mxu1 }
  0xe6   :  { %v185_v37 = vmax.f32 %v179_v36, 0.0  ;;  %v186_v38 = vadd.f32 %v183_v33, %v182_v31 }
  0xe8   :  { %187 = vadd.xlane.f32.xlu0 %v186_v38  ;;  %v189_v39 = vadd.f32 %v185_v37, %v184_v35 }
  0xec   :  { %190 = vadd.xlane.f32.xlu0 %v189_v39 }
 0x175   :  { %v188_v41 = vpop.xlane.xlu0 %187 }
 0x179   :  { %v191_v42 = vpop.xlane.xlu0 %190 }
 0x17a   :  { %v193_v43 = vsel %vm192_vm2, %v188_v41, %v191_v42 }
 0x17b   :  { %v194_v44 = vmul.f32 0.00390625, %v193_v43 }
 0x17d   :  { %201 = vxpose.xlu1.b32.start.end [1/1] (short) (narrow) %v194_v44, 8 }
 0x1fd   :  { %v217_v45 = vpop.trf.xlu1 }
 0x1fe   :  { %331 = vmatmul.mubr.msk.f32.vlgmr.msra.gmra.mrb[2].mxu0 %vm233_vm3, %v217_v45 }
 0x2d1   :  { %v303_v47 = vpop.f32.mrb[2].mxu0 }
 0x2d2   :  { %v304_v48 = vadd.f32 %v324_v46, %v303_v47  ;;  %v332_v49 = vpop.f32.mrb[3].mxu0 }
 0x2d4   :  { %307 = vst [vmem:[#allocation2] sm:$0x3] %v304_v48 }
 0x2d5   :  { %363 = shalt.err (!%p360_p4)
}
 0x2d6   :  { %s364_s7 = scalar_lea.hbm %s483_s3, 32 }
 0x2d7   :  { %p365_p5 = scmp.ne.s32.totalorder %s483_s3, %s364_s7  ;;  %p368_p6 = scmp.lt.u32.totalorder %s364_s7, %s483_s3 }
 0x2d9   :  { %p370_p7 = pnand %p368_p6, %p365_p5 }
 0x2db   :  { %373 = shalt.err (!%p370_p7)
}
 0x2dc   :  { %317 = dma.vmem_to_hbm [thread:$0]  %s315_s30, 32, %s483_s3, [#allocation3]  }
 0x2dd   :  { %374 = dma.done.wait [#allocation3], 32  }
 0x2de   :  { %375 = vsyncadd [#allocation3], 4294967264 }
 0x2df   :  { %321 = vsyncpa [#allocation3], 1 }

</bundles_post_ra>
